<compile_context>
chip_gen: v7x
topology: tpu7x:2x2x1
jax: 0.10.0
libtpu: 0.0.40
codegen_flags: <defaults>
</compile_context>

<pallas_src>
import functools

import jax
import jax.numpy as jnp
from jax import lax
from jax.experimental import pallas as pl
from jax.experimental.pallas import tpu as pltpu


def _p2sgrad_kernel(scores_ref, target_ref, loss_ref, *, target_is_index):
    scores = scores_ref[...]                       # (B, C), batch=sublane, class=lane
    if scores.dtype != jnp.float32:                # gate cast: no-op for f32 inputs
        scores = scores.astype(jnp.float32)
    B, C = scores.shape

    col = lax.broadcasted_iota(jnp.int32, (B, C), 1)

    if target_is_index:
        # target already holds class indices, shape (B, 1) -> mirrors target.long()
        idx = target_ref[...].astype(jnp.int32)
    else:
        labels = target_ref[...]
        if labels.dtype != jnp.float32:
            labels = labels.astype(jnp.float32)
        # first-maximal index == torch.argmax(target, dim=1, keepdim=True)
        max_val = jnp.max(labels, axis=1, keepdims=True)
        idx = jnp.min(jnp.where(labels == max_val, col, C), axis=1, keepdims=True)

    # index.scatter_(1, target, 1)  ->  one-hot rows
    one_hot = (col == idx).astype(jnp.float32)     # (B, C)
    diff = scores - one_hot
    # nn.MSELoss(): mean over all B*C elements; full reduce -> scalar -> SMEM.
    loss_ref[0] = jnp.sum(diff * diff) * (1.0 / (B * C))


def p2sgrad_loss(input_score, target):
    """Mirrors P2SGradLoss.forward (label_reverse=False): returns a scalar loss."""
    # TODO(synk): label_reverse branch uses Python random.seed/random.sample on
    # tensor data; no clean in-kernel equivalent (module default is False), skipped.
    B, C = input_score.shape
    target_is_index = target.shape[1] == 1

    kernel = functools.partial(_p2sgrad_kernel, target_is_index=target_is_index)
    loss = pl.pallas_call(
        kernel,
        out_shape=jax.ShapeDtypeStruct((1,), jnp.float32),
        in_specs=[
            pl.BlockSpec(memory_space=pltpu.VMEM),
            pl.BlockSpec(memory_space=pltpu.VMEM),
        ],
        out_specs=pl.BlockSpec(memory_space=pltpu.SMEM),   # scalar out via SMEM
    )(input_score, target)
    return loss[0]


def _reference(input_score, target):
    # pure-JAX reference for a sanity check
    if target.shape[1] != 1:
        idx = jnp.argmax(target, axis=1)
    else:
        idx = target.reshape(-1).astype(jnp.int32)
    one_hot = jax.nn.one_hot(idx, input_score.shape[1], dtype=jnp.float32)
    return jnp.mean((input_score - one_hot) ** 2)


if __name__ == "__main__":
    key = jax.random.PRNGKey(0)
    k1, k2 = jax.random.split(key, 2)
    B, C = 8, 2
    input_score = jax.random.normal(k1, (B, C), dtype=jnp.float32)   # cos-theta scores
    label_idx = jax.random.randint(k2, (B,), 0, C)
    target_onehot = jax.nn.one_hot(label_idx, C, dtype=jnp.float32)  # (B, C) labels

    # Path 1: (B, C) label matrix -> argmax done inside the kernel.
    loss1 = p2sgrad_loss(input_score, target_onehot)
    jax.block_until_ready(loss1)
    ref1 = _reference(input_score, target_onehot)
    assert jnp.allclose(loss1, ref1, atol=1e-5), (loss1, ref1)

    # Path 2: (B, 1) class-index target (target.shape[1] == 1 branch of the module).
    target_idx = label_idx.reshape(B, 1).astype(jnp.float32)
    loss2 = p2sgrad_loss(input_score, target_idx)
    jax.block_until_ready(loss2)
    ref2 = _reference(input_score, target_idx)
    assert jnp.allclose(loss2, ref2, atol=1e-5), (loss2, ref2)
    assert jnp.allclose(loss1, loss2, atol=1e-5)

    print("KERNEL_OK")
</pallas_src>

<mosaic_0001>
module attributes {stable_mosaic.version = 11 : i64} {
  func.func @_p2sgrad_kernel(%arg0: memref<8x2xf32, #tpu.memory_space<vmem>>, %arg1: memref<8x2xf32, #tpu.memory_space<vmem>>, %arg2: memref<1xf32, #tpu.memory_space<smem>>) attributes {dimension_semantics = [], scalar_prefetch = 0 : i64, scratch_operands = 0 : i64, tpu.core_type = #tpu.core_type<tc>} {
    %c0 = arith.constant 0 : index
    %c0_0 = arith.constant 0 : index
    %0 = vector.load %arg0[%c0, %c0_0] : memref<8x2xf32, #tpu.memory_space<vmem>>, vector<8x2xf32>
    %1 = tpu.iota {dimensions = array<i32: 1>} : vector<8x2xi32>
    %c0_1 = arith.constant 0 : index
    %c0_2 = arith.constant 0 : index
    %2 = vector.load %arg1[%c0_1, %c0_2] : memref<8x2xf32, #tpu.memory_space<vmem>>, vector<8x2xf32>
    %cst = arith.constant dense<0xFF800000> : vector<8xf32>
    %3 = vector.multi_reduction <maximumf>, %2, %cst [1] : vector<8x2xf32> to vector<8xf32>
    %4 = vector.shape_cast %3 : vector<8xf32> to vector<8x1xf32>
    %5 = vector.broadcast %4 : vector<8x1xf32> to vector<8x2xf32>
    %6 = arith.cmpf oeq, %2, %5 : vector<8x2xf32>
    %c2_i32 = arith.constant 2 : i32
    %7 = vector.broadcast %c2_i32 : i32 to vector<8x2xi32>
    %8 = arith.select %6, %1, %7 : vector<8x2xi1>, vector<8x2xi32>
    %cst_3 = arith.constant dense<2147483647> : vector<8xi32>
    %9 = vector.multi_reduction <minsi>, %8, %cst_3 [1] : vector<8x2xi32> to vector<8xi32>
    %10 = vector.shape_cast %9 : vector<8xi32> to vector<8x1xi32>
    %11 = vector.broadcast %10 : vector<8x1xi32> to vector<8x2xi32>
    %12 = arith.cmpi eq, %1, %11 : vector<8x2xi32>
    %13 = arith.extui %12 : vector<8x2xi1> to vector<8x2xi32>
    %14 = arith.sitofp %13 : vector<8x2xi32> to vector<8x2xf32>
    %15 = arith.subf %0, %14 : vector<8x2xf32>
    %16 = arith.mulf %15, %15 : vector<8x2xf32>
    %17 = vector.shape_cast %16 : vector<8x2xf32> to vector<1x8x2xf32>
    %cst_4 = arith.constant dense<0.000000e+00> : vector<1xf32>
    %18 = vector.multi_reduction <add>, %17, %cst_4 [1, 2] : vector<1x8x2xf32> to vector<1xf32>
    %19 = vector.shape_cast %18 : vector<1xf32> to vector<1x1x1xf32>
    %20 = vector.extract %19[0, 0, 0] : f32 from vector<1x1x1xf32>
    %cst_5 = arith.constant 6.250000e-02 : f32
    %21 = arith.mulf %20, %cst_5 : f32
    %c0_6 = arith.constant 0 : index
    %22 = memref.load %arg2[%c0_6] : memref<1xf32, #tpu.memory_space<smem>>
    memref.store %21, %arg2[%c0_6] : memref<1xf32, #tpu.memory_space<smem>>
    return
  }
}

</mosaic_0001>

<bundles_post_ra>
// kernel: tpu_custom_call.1
= control target key start
LH: loop header
LB: loop body
LE: loop exit
PB: predicated region body
PF: predicated region fallthrough
CT: control target
= control target key end

     0   :  { %vm16_vm0 = vcmask 15360   ;;  %s123_s0 = inlined_call_operand.vmem [shape: f32[8,2], index: 0, kind: input, shape index: {}]   ;;  %s124_s1 = inlined_call_operand.vmem [shape: f32[8,2], index: 1, kind: input, shape index: {}]   ;;  %s125_s2 = inlined_call_operand.hbm [shape: f32[1], index: 2, kind: output, shape index: {}]  }
   0x1   :  { %v15_v0 = vld [vmem:[%s124_s1] sm:$0xff] }
   0x2   :  { %7 = vsyncpa [#allocation3], 0  ;;  %v17_v1 = vsel %vm16_vm0, %v15_v0, -inf  ;;  %v13_v2 = vlaneseq  ;;  %v12_v18 = vld [vmem:[%s123_s0] sm:$0xff]  ;;  %v85_v19 = vmov 0.0   ;;  %s73_s15 = scalar_lea.hbm %s125_s2, 16 }
   0x3   :  { %18 = vmax.xlane.f32.xlu0 %v17_v1  ;;  %p74_p0 = scmp.ne.s32.totalorder %s125_s2, %s73_s15  ;;  %p77_p1 = scmp.lt.u32.totalorder %s73_s15, %s125_s2 }
   0x4   :  { %v14_v3 = vand.u32 127, %v13_v2 }
   0x5   :  { %p79_p2 = pnand %p77_p1, %p74_p0 }
  0x90   :  { %v19_v4 = vpop.xlane.xlu0 %18 }
  0x91   :  { %vm20_vm1 = vcmp.eq.f32.partialorder %v15_v0, %v19_v4 }
  0x92   :  { %v21_v5 = vsel %vm20_vm1, %v14_v3, 2 }
  0x93   :  { %v22_v6 = vsel %vm16_vm0, %v21_v5, 2147483647 }
  0x94   :  { %v24_v7 = vshra.s32 %v22_v6, 16  ;;  %v23_v9 = vand.u32 65535, %v22_v6 }
  0x96   :  { %v26_v8 = vcvt.s32.f32 %v24_v7  ;;  %v25_v11 = vcvt.s32.f32 %v23_v9 }
  0x98   :  { %27 = vmin.xlane.f32.xlu0 %v26_v8 }
 0x125   :  { %v28_v10 = vpop.xlane.xlu0 %27 }
 0x126   :  { %vm29_vm2 = vcmp.eq.f32.partialorder %v26_v8, %v28_v10  ;;  %v34_v13 = vcvt.f32.s32 %v28_v10 }
 0x127   :  { %v30_v12 = vsel %vm29_vm2, %v25_v11, inf }
 0x128   :  { %31 = vmin.xlane.f32.xlu1 %v30_v12  ;;  %v35_v15 = vshll.u32 %v34_v13, 16 }
 0x1b5   :  { %v32_v14 = vpop.xlane.xlu1 %31 }
 0x1b6   :  { %v33_v16 = vcvt.f32.s32 %v32_v14 }
 0x1b8   :  { %v36_v17 = vadd.s32 %v35_v15, %v33_v16 }
 0x1ba   :  { %vm37_vm3 = vcmp.eq.s32.totalorder %v14_v3, %v36_v17 }
 0x1bb   :  { %v68_v20 = vsel %vm37_vm3, 1.0, %v85_v19 }
 0x1bc   :  { %v40_v21 = vsub.f32 %v12_v18, %v68_v20 }
 0x1be   :  { %v41_v22 = vmul.f32 %v40_v21, %v40_v21 }
 0x1c0   :  { %v42_v23 = vsel %vm16_vm0, %v41_v22, 0.0 }
 0x1c1   :  { %43 = vadd.xlane.f32.xlu1 %v42_v23 }
 0x24e   :  { %v44_v24 = vpop.xlane.xlu1 %43 }
 0x24f   :  { %v45_v25 = vrot.slane %v44_v24, 4 }
 0x251   :  { %v46_v26 = vadd.f32 %v45_v25, %v44_v24 }
 0x253   :  { %v47_v27 = vrot.slane %v46_v26, 2 }
 0x255   :  { %v48_v28 = vadd.f32 %v47_v27, %v46_v26 }
 0x257   :  { %v49_v29 = vrot.slane %v48_v28, 1 }
 0x259   :  { %v50_v30 = vadd.f32 %v49_v29, %v48_v28 }
 0x25b   :  { %69 = vpush %v50_v30 }
 0x28c   :  { %s70_s12 = spop %69 }
 0x28d   :  { %s52_s13 = smul.f32 0.0625, %s70_s12 }
 0x28f   :  { %54 = sst [smem:[#allocation2]] %s52_s13 }
 0x290   :  { %82 = shalt.err (!%p79_p2)
}
 0x291   :  { %s86_s20 = smov [#allocation2]  }
 0x292   :  { %62 = dma.smem_to_hbm %s86_s20, 16, %s125_s2, [#allocation3]  }
 0x293   :  { %83 = dma.done.wait [#allocation3], 16  }
 0x294   :  { %84 = vsyncadd [#allocation3], 4294967280 }
 0x295   :  { %66 = sfence }
 0x296   :  { %67 = vsyncpa [#allocation3], 1 }

</bundles_post_ra>
